<compile_context>
chip_gen: v7x
topology: tpu7x:2x2x1
jax: 0.10.0
libtpu: 0.0.40
codegen_flags: <defaults>
</compile_context>

<pallas_src>
import functools

import jax
import jax.numpy as jnp
from jax.experimental import pallas as pl
from jax.experimental.pallas import tpu as pltpu

EPS = 1e-5
ROW_TILE = 512                  # rows per grid step (512-1024 sweet spot)
K_TILE_MAX = 512                # K tiling threshold / tile size
LANE = 128                      # channel padding target (lane-dense stores)
VMEM_LIMIT = 32 * 1024 * 1024   # safe on v5e/v6e (128 MiB) and v7x (64 MiB)


def _round_up(x, m):
    return (x + m - 1) // m * m


def _pad2d(x, rows, cols):
    r, c = x.shape
    return jnp.pad(x, ((0, rows - r), (0, cols - c)))


# ---------------------------------------------------------------------------
# Fused conv-as-matmul + BatchNorm statistics kernel
# ---------------------------------------------------------------------------
def _conv_stats_kernel(a_ref, b_ref, o_ref, sum_ref, sq_ref):
    k = pl.program_id(1)

    @pl.when(k == 0)
    def _():
        o_ref[...] = jnp.zeros_like(o_ref)

    # bf16 x bf16 -> f32 accumulation on the MXU; accumulator lives in the
    # (row-tile resident) output block across the K axis.
    o_ref[...] += jnp.dot(a_ref[...], b_ref[...],
                          preferred_element_type=jnp.float32)

    @pl.when(k == pl.num_programs(1) - 1)
    def _():
        acc = o_ref[...]
        # Per-row-tile partial channel sums / sums of squares, computed while
        # the f32 tile is still in VMEM (epilogue only, not every grid step).
        # Partials are written to distinct blocks per row tile, so the row
        # axis stays safely "parallel" on megacore parts.
        sum_ref[...] = jnp.sum(acc, axis=0, keepdims=True)[None]
        sq_ref[...] = jnp.sum(acc * acc, axis=0, keepdims=True)[None]


def pallas_conv_stats(a, b, tm=ROW_TILE):
    """(Np, Kp) bf16 @ (Kp, Cp) bf16 -> f32 (Np, Cp), plus per-row-tile partial
    channel sums / sums-of-squares of the result (for BatchNorm)."""
    Np, Kp = a.shape
    Kp2, Cp = b.shape
    assert Kp == Kp2 and Np % tm == 0 and Cp % LANE == 0
    tk = Kp if Kp <= K_TILE_MAX else K_TILE_MAX
    assert Kp % tk == 0
    n_rt = Np // tm

    cost = pl.CostEstimate(
        flops=2 * Np * Kp * Cp,
        transcendentals=0,
        bytes_accessed=int(a.size * a.dtype.itemsize
                           + b.size * b.dtype.itemsize + Np * Cp * 4))

    return pl.pallas_call(
        _conv_stats_kernel,
        out_shape=(jax.ShapeDtypeStruct((Np, Cp), jnp.float32),
                   jax.ShapeDtypeStruct((n_rt, 1, Cp), jnp.float32),
                   jax.ShapeDtypeStruct((n_rt, 1, Cp), jnp.float32)),
        grid=(n_rt, Kp // tk),
        in_specs=[pl.BlockSpec((tm, tk), lambda i, k: (i, k)),
                  pl.BlockSpec((tk, Cp), lambda i, k: (k, 0))],
        out_specs=(pl.BlockSpec((tm, Cp), lambda i, k: (i, 0)),
                   pl.BlockSpec((1, 1, Cp), lambda i, k: (i, 0, 0)),
                   pl.BlockSpec((1, 1, Cp), lambda i, k: (i, 0, 0))),
        compiler_params=pltpu.CompilerParams(
            dimension_semantics=("parallel", "arbitrary"),
            vmem_limit_bytes=VMEM_LIMIT),
        cost_estimate=cost,
    )(a, b)


# ---------------------------------------------------------------------------
# Fused BN apply (+ optional residual) (+ optional ReLU) elementwise kernel
# ---------------------------------------------------------------------------
def _bn_apply_kernel(x_ref, scale_ref, shift_ref, o_ref, *, relu):
    y = x_ref[...] * scale_ref[...] + shift_ref[...]
    if relu:
        y = jnp.maximum(y, 0.0)
    o_ref[...] = y.astype(o_ref.dtype)


def _bn_apply_res_kernel(x_ref, scale_ref, shift_ref, res_ref, o_ref, *, relu):
    y = x_ref[...] * scale_ref[...] + shift_ref[...] + res_ref[...]
    if relu:
        y = jnp.maximum(y, 0.0)
    o_ref[...] = y.astype(o_ref.dtype)


def pallas_bn_apply(x, scale, shift, res=None, relu=False,
                    out_dtype=jnp.float32, tm=ROW_TILE):
    """y = x*scale + shift (+ res) (optionally ReLU), tiled over rows."""
    Np, Cp = x.shape
    assert Np % tm == 0 and Cp % LANE == 0
    row_spec = pl.BlockSpec((tm, Cp), lambda i: (i, 0))
    vec_spec = pl.BlockSpec((1, Cp), lambda i: (0, 0))
    if res is None:
        kern = functools.partial(_bn_apply_kernel, relu=relu)
        in_specs = [row_spec, vec_spec, vec_spec]
        args = (x, scale, shift)
    else:
        kern = functools.partial(_bn_apply_res_kernel, relu=relu)
        in_specs = [row_spec, vec_spec, vec_spec, row_spec]
        args = (x, scale, shift, res)
    return pl.pallas_call(
        kern,
        out_shape=jax.ShapeDtypeStruct((Np, Cp), out_dtype),
        grid=(Np // tm,),
        in_specs=in_specs,
        out_specs=row_spec,
        compiler_params=pltpu.CompilerParams(
            dimension_semantics=("parallel",),
            vmem_limit_bytes=VMEM_LIMIT),
    )(*args)


# ---------------------------------------------------------------------------
# Plain-JAX glue (im2col, per-channel scalar math, padding / reshapes)
# ---------------------------------------------------------------------------
def im2col_3x3(x, stride):
    """x: (B,H,W,C) -> patches (B*Ho*Wo, 9*C), patch order (ky, kx, cin)."""
    B, H, W, C = x.shape
    Ho = (H - 1) // stride + 1
    Wo = (W - 1) // stride + 1
    xp = jnp.pad(x, ((0, 0), (1, 1), (1, 1), (0, 0)))
    cols = []
    for ky in range(3):
        for kx in range(3):
            cols.append(xp[:, ky:ky + 1 + stride * (Ho - 1):stride,
                           kx:kx + 1 + stride * (Wo - 1):stride, :])
    p = jnp.concatenate(cols, axis=-1)
    return p.reshape(B * Ho * Wo, 9 * C), (B, Ho, Wo)


def _bn_scale_shift(psum, psq, n_valid, gamma, beta, Cp):
    """Training-mode BatchNorm folded into per-channel scale/shift (f32)."""
    total = jnp.sum(psum, axis=(0, 1))           # (Cp,)
    total_sq = jnp.sum(psq, axis=(0, 1))
    mean = total / n_valid
    var = jnp.maximum(total_sq / n_valid - mean * mean, 0.0)   # clamp >= 0
    g = jnp.pad(gamma, (0, Cp - gamma.shape[0]))
    b = jnp.pad(beta, (0, Cp - beta.shape[0]))
    scale = g / jnp.sqrt(var + EPS)
    shift = b - mean * scale
    return scale.reshape(1, Cp), shift.reshape(1, Cp)


def _prep_conv_operands(patches, w2d, Np):
    """Pad patches/weights for the fused kernel (bf16, K/C padding)."""
    N, K = patches.shape
    Cout = w2d.shape[1]
    Kp = K if K <= K_TILE_MAX else _round_up(K, K_TILE_MAX)
    Cp = _round_up(Cout, LANE)
    a = _pad2d(patches.astype(jnp.bfloat16), Np, Kp)
    b = _pad2d(w2d.astype(jnp.bfloat16), Kp, Cp)
    return a, b


def basic_block_forward(x_nhwc, params, stride=1):
    """Pallas implementation of BasicBlock.forward.  x_nhwc: (B,H,W,Cin) f32."""
    in_planes = x_nhwc.shape[-1]
    planes = params["w1"].shape[0]
    Cp = _round_up(planes, LANE)

    x_bf16 = x_nhwc.astype(jnp.bfloat16)

    # ---- conv1 (3x3, stride) with fused bn1 stats, then bn1-apply + ReLU ----
    p1, (B, Ho, Wo) = im2col_3x3(x_bf16, stride)
    N = B * Ho * Wo
    Np = _round_up(N, ROW_TILE)
    w1 = params["w1"].transpose(2, 3, 1, 0).reshape(9 * in_planes, planes)
    a1, b1 = _prep_conv_operands(p1, w1, Np)
    c1, s1, q1 = pallas_conv_stats(a1, b1)
    scale1, shift1 = _bn_scale_shift(s1, q1, N, params["g1"], params["b1"], Cp)
    # out1 only feeds the next bf16 matmul -> emit bf16 (halves HBM traffic)
    out1 = pallas_bn_apply(c1, scale1, shift1, relu=True,
                           out_dtype=jnp.bfloat16)

    # ---- conv2 (3x3, stride 1) with fused bn2 stats ----
    out1_img = out1[:N, :planes].reshape(B, Ho, Wo, planes)
    p2, _ = im2col_3x3(out1_img, 1)
    w2 = params["w2"].transpose(2, 3, 1, 0).reshape(9 * planes, planes)
    a2, b2 = _prep_conv_operands(p2, w2, Np)
    c2, s2, q2 = pallas_conv_stats(a2, b2)
    scale2, shift2 = _bn_scale_shift(s2, q2, N, params["g2"], params["b2"], Cp)

    # ---- shortcut ----
    if stride != 1 or in_planes != planes:
        xs = x_bf16[:, ::stride, ::stride, :].reshape(N, in_planes)
        ws = params["ws"].transpose(2, 3, 1, 0).reshape(in_planes, planes)
        asc, bsc = _prep_conv_operands(xs, ws, Np)
        cs, ss, qs = pallas_conv_stats(asc, bsc)
        scs, shs = _bn_scale_shift(ss, qs, N, params["gs"], params["bs"], Cp)
        shortcut = pallas_bn_apply(cs, scs, shs, relu=False)      # f32
    else:
        shortcut = _pad2d(x_nhwc.reshape(N, planes).astype(jnp.float32),
                          Np, Cp)

    # ---- out = relu(bn2(conv2) + shortcut)  (fused residual add + ReLU) ----
    out = pallas_bn_apply(c2, scale2, shift2, res=shortcut, relu=True)
    return out[:N, :planes].reshape(B, Ho, Wo, planes)


# ---------------------------------------------------------------------------
# Pure-JAX reference (same bf16-input / f32-accumulation conv precision)
# ---------------------------------------------------------------------------
def ref_forward(x_nhwc, params, stride):
    def conv(x, w, s, pad):
        return jax.lax.conv_general_dilated(
            x.astype(jnp.bfloat16),
            jnp.transpose(w, (2, 3, 1, 0)).astype(jnp.bfloat16),
            (s, s), ((pad, pad), (pad, pad)),
            dimension_numbers=("NHWC", "HWIO", "NHWC"),
            preferred_element_type=jnp.float32)

    def bn(x, g, b):
        mean = x.mean(axis=(0, 1, 2))
        var = x.var(axis=(0, 1, 2))
        return (x - mean) / jnp.sqrt(var + EPS) * g + b

    in_planes = x_nhwc.shape[-1]
    planes = params["w1"].shape[0]
    out = jax.nn.relu(bn(conv(x_nhwc, params["w1"], stride, 1),
                         params["g1"], params["b1"]))
    out = bn(conv(out, params["w2"], 1, 1), params["g2"], params["b2"])
    if stride != 1 or in_planes != planes:
        sc = bn(conv(x_nhwc, params["ws"], stride, 0),
                params["gs"], params["bs"])
    else:
        sc = x_nhwc
    return jax.nn.relu(out + sc)


# ---------------------------------------------------------------------------
if __name__ == "__main__":
    B, in_planes, planes, H, W, stride = 2, 4, 8, 16, 16, 1

    key = jax.random.PRNGKey(0)
    k = jax.random.split(key, 8)
    params = {
        "w1": 0.1 * jax.random.normal(k[0], (planes, in_planes, 3, 3),
                                      jnp.float32),
        "g1": 1.0 + 0.1 * jax.random.normal(k[1], (planes,), jnp.float32),
        "b1": 0.1 * jax.random.normal(k[2], (planes,), jnp.float32),
        "w2": 0.1 * jax.random.normal(k[3], (planes, planes, 3, 3),
                                      jnp.float32),
        "g2": 1.0 + 0.1 * jax.random.normal(k[4], (planes,), jnp.float32),
        "b2": 0.1 * jax.random.normal(k[5], (planes,), jnp.float32),
        # shortcut (1x1 conv + BN), active because in_planes != planes
        "ws": 0.1 * jax.random.normal(k[6], (planes, in_planes, 1, 1),
                                      jnp.float32),
        "gs": jnp.ones((planes,), jnp.float32),
        "bs": jnp.zeros((planes,), jnp.float32),
    }

    # PyTorch input is NCHW; generate NCHW then move to NHWC for the kernels.
    x_nchw = jax.random.normal(k[7], (B, in_planes, H, W), jnp.float32)
    x_nhwc = jnp.transpose(x_nchw, (0, 2, 3, 1))

    out_nhwc = basic_block_forward(x_nhwc, params, stride=stride)
    out_nchw = jnp.transpose(out_nhwc, (0, 3, 1, 2))
    jax.block_until_ready(out_nchw)

    ref_nhwc = ref_forward(x_nhwc, params, stride)
    Ho = (H - 1) // stride + 1
    Wo = (W - 1) // stride + 1
    assert out_nchw.shape == (B, planes, Ho, Wo)
    # bf16 matmul inputs on both sides; tolerance covers bf16 rounding-order
    # differences between the Pallas path and the XLA conv reference.
    assert jnp.allclose(out_nhwc, ref_nhwc, atol=5e-3, rtol=5e-3)

    print("KERNEL_OK")
</pallas_src>

<mosaic_0001>
module attributes {stable_mosaic.version = 11 : i64} {
  func.func @_conv_stats_kernel(%arg0: i32, %arg1: i32, %arg2: memref<512x36xbf16, #tpu.memory_space<vmem>>, %arg3: memref<36x128xbf16, #tpu.memory_space<vmem>>, %arg4: memref<512x128xf32, #tpu.memory_space<vmem>>, %arg5: memref<1x1x128xf32, #tpu.memory_space<vmem>>, %arg6: memref<1x1x128xf32, #tpu.memory_space<vmem>>) attributes {dimension_semantics = [#tpu.dimension_semantics<parallel>, #tpu.dimension_semantics<arbitrary>], iteration_bounds = array<i64: 1, 1>, scalar_prefetch = 0 : i64, scratch_operands = 0 : i64, tpu.core_type = #tpu.core_type<tc>, window_params = [{transform_indices = @transform_0, window_bounds = array<i64: 512, 36>}, {transform_indices = @transform_1, window_bounds = array<i64: 36, 128>}, {transform_indices = @transform_2, window_bounds = array<i64: 512, 128>}, {transform_indices = @transform_3, window_bounds = array<i64: 1, 1, 128>}, {transform_indices = @transform_4, window_bounds = array<i64: 1, 1, 128>}]} {
    %c0_i32 = arith.constant 0 : i32
    %0 = arith.cmpi eq, %arg1, %c0_i32 : i32
    %1 = arith.extui %0 : i1 to i32
    %c0_i32_0 = arith.constant 0 : i32
    %2 = arith.cmpi ne, %1, %c0_i32_0 : i32
    scf.if %2 {
      %cst_10 = arith.constant 0.000000e+00 : f32
      %12 = vector.broadcast %cst_10 : f32 to vector<512x128xf32>
      %c0_11 = arith.constant 0 : index
      %c0_12 = arith.constant 0 : index
      %13 = vector.load %arg4[%c0_11, %c0_12] : memref<512x128xf32, #tpu.memory_space<vmem>>, vector<512x128xf32>
      tpu.vector_store %arg4[%c0_11, %c0_12], %12 {strides = array<i32>} : memref<512x128xf32, #tpu.memory_space<vmem>>, vector<512x128xf32>,
    } else {
    }
    %c0 = arith.constant 0 : index
    %c0_1 = arith.constant 0 : index
    %3 = vector.load %arg4[%c0, %c0_1] : memref<512x128xf32, #tpu.memory_space<vmem>>, vector<512x128xf32>
    %c0_2 = arith.constant 0 : index
    %c0_3 = arith.constant 0 : index
    %4 = vector.load %arg2[%c0_2, %c0_3] : memref<512x36xbf16, #tpu.memory_space<vmem>>, vector<512x36xbf16>
    %c0_4 = arith.constant 0 : index
    %c0_5 = arith.constant 0 : index
    %5 = vector.load %arg3[%c0_4, %c0_5] : memref<36x128xbf16, #tpu.memory_space<vmem>>, vector<36x128xbf16>
    %cst = arith.constant dense<0.000000e+00> : vector<512x128xf32>
    %6 = tpu.matmul %4, %5, %cst {dimension_numbers = #tpu.dot_dimension_numbers<[1], [0], [0], [1], [0, 0, 1, 1], [], []>} : vector<512x36xbf16>, vector<36x128xbf16>, vector<512x128xf32> -> vector<512x128xf32>
    %7 = arith.addf %3, %6 : vector<512x128xf32>
    %c0_6 = arith.constant 0 : index
    %c0_7 = arith.constant 0 : index
    %8 = vector.load %arg4[%c0_6, %c0_7] : memref<512x128xf32, #tpu.memory_space<vmem>>, vector<512x128xf32>
    tpu.vector_store %arg4[%c0_6, %c0_7], %7 {strides = array<i32>} : memref<512x128xf32, #tpu.memory_space<vmem>>, vector<512x128xf32>,
    %c0_i32_8 = arith.constant 0 : i32
    %9 = arith.cmpi eq, %arg1, %c0_i32_8 : i32
    %10 = arith.extui %9 : i1 to i32
    %c0_i32_9 = arith.constant 0 : i32
    %11 = arith.cmpi ne, %10, %c0_i32_9 : i32
    scf.if %11 {
      %c0_10 = arith.constant 0 : index
      %c0_11 = arith.constant 0 : index
      %12 = vector.load %arg4[%c0_10, %c0_11] : memref<512x128xf32, #tpu.memory_space<vmem>>, vector<512x128xf32>
      %cst_12 = arith.constant dense<0.000000e+00> : vector<128xf32>
      %13 = vector.multi_reduction <add>, %12, %cst_12 [0] : vector<512x128xf32> to vector<128xf32>
      %14 = vector.shape_cast %13 : vector<128xf32> to vector<1x128xf32>
      %15 = vector.shape_cast %14 : vector<1x128xf32> to vector<1x1x128xf32>
      %c0_13 = arith.constant 0 : index
      %c0_14 = arith.constant 0 : index
      %c0_15 = arith.constant 0 : index
      %16 = vector.load %arg5[%c0_13, %c0_14, %c0_15] : memref<1x1x128xf32, #tpu.memory_space<vmem>>, vector<1x1x128xf32>
      tpu.vector_store %arg5[%c0_13, %c0_14, %c0_15], %15 {strides = array<i32>} : memref<1x1x128xf32, #tpu.memory_space<vmem>>, vector<1x1x128xf32>,
      %17 = arith.mulf %12, %12 : vector<512x128xf32>
      %cst_16 = arith.constant dense<0.000000e+00> : vector<128xf32>
      %18 = vector.multi_reduction <add>, %17, %cst_16 [0] : vector<512x128xf32> to vector<128xf32>
      %19 = vector.shape_cast %18 : vector<128xf32> to vector<1x128xf32>
      %20 = vector.shape_cast %19 : vector<1x128xf32> to vector<1x1x128xf32>
      %c0_17 = arith.constant 0 : index
      %c0_18 = arith.constant 0 : index
      %c0_19 = arith.constant 0 : index
      %21 = vector.load %arg6[%c0_17, %c0_18, %c0_19] : memref<1x1x128xf32, #tpu.memory_space<vmem>>, vector<1x1x128xf32>
      tpu.vector_store %arg6[%c0_17, %c0_18, %c0_19], %20 {strides = array<i32>} : memref<1x1x128xf32, #tpu.memory_space<vmem>>, vector<1x1x128xf32>,
    } else {
    }
    return
  }
  func.func @transform_0(%arg0: i32, %arg1: i32) -> (i32, i32) {
    %c0_i32 = arith.constant 0 : i32
    return %arg0, %arg1 : i32, i32
  }
  func.func @transform_1(%arg0: i32, %arg1: i32) -> (i32, i32) {
    %c0_i32 = arith.constant 0 : i32
    %c0_i32_0 = arith.constant 0 : i32
    return %arg1, %c0_i32 : i32, i32
  }
  func.func @transform_2(%arg0: i32, %arg1: i32) -> (i32, i32) {
    %c0_i32 = arith.constant 0 : i32
    %c0_i32_0 = arith.constant 0 : i32
    return %arg0, %c0_i32 : i32, i32
  }
  func.func @transform_3(%arg0: i32, %arg1: i32) -> (i32, i32, i32) {
    %c0_i32 = arith.constant 0 : i32
    %c0_i32_0 = arith.constant 0 : i32
    %c0_i32_1 = arith.constant 0 : i32
    return %arg0, %c0_i32, %c0_i32_0 : i32, i32, i32
  }
  func.func @transform_4(%arg0: i32, %arg1: i32) -> (i32, i32, i32) {
    %c0_i32 = arith.constant 0 : i32
    %c0_i32_0 = arith.constant 0 : i32
    %c0_i32_1 = arith.constant 0 : i32
    return %arg0, %c0_i32, %c0_i32_0 : i32, i32, i32
  }
}

</mosaic_0001>

<bundles_post_ra>
// kernel: tpu_custom_call.1
= control target key start
LH: loop header
LB: loop body
LE: loop exit
PB: predicated region body
PF: predicated region fallthrough
CT: control target
= control target key end

     0   :  { %10 = vsyncpa [#allocation3], 0  ;;  %vm393_vm0 = vcmask 293888   ;;  %vm490_vm1 = vcmask 1041408   ;;  %s1919_s0 = inlined_call_operand.vmem [shape: bf16[512,36], index: 0, kind: input, shape index: {}]   ;;  %s1920_s1 = inlined_call_operand.vmem [shape: bf16[36,128], index: 1, kind: input, shape index: {}]   ;;  %s1921_s2 = inlined_call_operand.hbm [shape: f32[512,128], index: 2, kind: output, shape index: {0}]   ;;  %s1922_s3 = inlined_call_operand.hbm [shape: f32[1,1,128], index: 3, kind: output, shape index: {1}]   ;;  %s1923_s4 = inlined_call_operand.hbm [shape: f32[1,1,128], index: 4, kind: output, shape index: {2}]  }
   0x1   :  { %v1411_v0 = vld [vmem:[%s1920_s1] sm:$0xff]   ;;  %v1412_v1 = vld [vmem:[%s1920_s1 + $0x8] sm:$0xff]   ;;  %v1413_v2 = vld [vmem:[%s1920_s1 + $0x10] ss:$0 sps:$4 sm:$0x33]  }
   0x2   :  { %1327 = vmatprep.subr.bf16.mxu0 %v1411_v0  ;;  %v1414_v3 = vld [vmem:[%s1919_s0] sm:$0xff]   ;;  %1397 = vmatprep.subr.bf16.mxu1 %v1411_v0  ;;  %v492_v4 = vsel %vm490_vm1, %v1413_v2, 0  ;;  %v1415_v5 = vld [vmem:[%s1919_s0 + $0x8] sm:$0xff]   ;;  %v1416_v6 = vld [vmem:[%s1919_s0 + $0x10] sm:$0xff]  }
   0x3   :  { %1328 = vmatpush3.bf16.msra.mxu0 %v1411_v0  ;;  %1400 = vmatpush3.bf16.msra.mxu1 %v1411_v0  ;;  %v1417_v7 = vld [vmem:[%s1919_s0 + $0x18] sm:$0xff]   ;;  %v1418_v8 = vld [vmem:[%s1919_s0 + $0x20] sm:$0xff]   ;;  %v1431_v10 = vld [vmem:[%s1919_s0 + $0x88] sm:$0xff]  }
   0x4   :  { %1329 = vmatprep.subr.bf16.mxu0 %v1412_v1  ;;  %1333 = vmatprep.mubr.msk.bf16.mxu0 %vm393_vm0, %v1414_v3  ;;  %v1430_v9 = vld [vmem:[%s1919_s0 + $0x80] sm:$0xff]   ;;  %v1432_v11 = vld [vmem:[%s1919_s0 + $0x90] sm:$0xff]   ;;  %v1419_v12 = vld [vmem:[%s1919_s0 + $0x28] sm:$0xff]  }
   0x5   :  { %1398 = vmatprep.subr.bf16.mxu1 %v1412_v1  ;;  %1365 = vmatprep.mubr.msk.bf16.mxu1 %vm393_vm0, %v1430_v9  ;;  %v1420_v13 = vld [vmem:[%s1919_s0 + $0x30] sm:$0xff]   ;;  %v1433_v14 = vld [vmem:[%s1919_s0 + $0x98] sm:$0xff]   ;;  %v1434_v15 = vld [vmem:[%s1919_s0 + $0xa0] sm:$0xff]  }
   0x6   :  { %v1421_v16 = vld [vmem:[%s1919_s0 + $0x38] sm:$0xff]   ;;  %v1435_v17 = vld [vmem:[%s1919_s0 + $0xa8] sm:$0xff]  }
   0x7   :  { %1330 = vmatpush3.bf16.msra.mxu0 %v1412_v1  ;;  %1401 = vmatpush3.bf16.msra.mxu1 %v1412_v1 }
   0x8   :  { %1403 = vmatprep.subr.msk.bf16.mxu0 %vm490_vm1, %v1413_v2  ;;  %1404 = vmatprep.subr.msk.bf16.mxu1 %vm490_vm1, %v1413_v2 }
   0xb   :  { %1332 = vmatpush3.bf16.msra.mxu0 %v492_v4  ;;  %1402 = vmatpush3.bf16.msra.mxu1 %v492_v4 }
   0xe   :  { %1334 = vmatmul.mubr.msk.bf16.vlgmr.msra.gmra.mrb[0].mxu0 %vm393_vm0, %v1415_v5  ;;  %1366 = vmatmul.mubr.msk.bf16.vlgmr.msra.gmra.mrb[0].mxu1 %vm393_vm0, %v1431_v10 }
   0xf   :  { %1337 = vmatprep.mubr.msk.bf16.mxu0 %vm393_vm0, %v1416_v6  ;;  %1369 = vmatprep.mubr.msk.bf16.mxu1 %vm393_vm0, %v1432_v11 }
  0x16   :  { %1338 = vmatmul.mubr.msk.bf16.gmra.mrb[4].mxu0 %vm393_vm0, %v1417_v7  ;;  %1370 = vmatmul.mubr.msk.bf16.gmra.mrb[4].mxu1 %vm393_vm0, %v1433_v14 }
  0x17   :  { %1341 = vmatprep.mubr.msk.bf16.mxu0 %vm393_vm0, %v1418_v8  ;;  %1373 = vmatprep.mubr.msk.bf16.mxu1 %vm393_vm0, %v1434_v15 }
  0x1e   :  { %1342 = vmatmul.mubr.msk.bf16.gmra.mrb[8].mxu0 %vm393_vm0, %v1419_v12 }
  0x1f   :  { %1345 = vmatprep.mubr.msk.bf16.mxu0 %vm393_vm0, %v1420_v13 }
  0x20   :  { %11 = vsyncpa [#allocation5], 0  ;;  %v1422_v18 = vld [vmem:[%s1919_s0 + $0x40] sm:$0xff]   ;;  %v1436_v19 = vld [vmem:[%s1919_s0 + $0xb0] sm:$0xff]   ;;  %1374 = vmatmul.mubr.msk.bf16.gmra.mrb[8].mxu1 %vm393_vm0, %v1435_v17 }
  0x21   :  { %1377 = vmatprep.mubr.msk.bf16.mxu1 %vm393_vm0, %v1436_v19  ;;  %v1423_v20 = vld [vmem:[%s1919_s0 + $0x48] sm:$0xff]   ;;  %v1437_v21 = vld [vmem:[%s1919_s0 + $0xb8] sm:$0xff]   ;;  %v1424_v22 = vld [vmem:[%s1919_s0 + $0x50] sm:$0xff]  }
  0x22   :  { %v1438_v23 = vld [vmem:[%s1919_s0 + $0xc0] sm:$0xff]   ;;  %v1425_v24 = vld [vmem:[%s1919_s0 + $0x58] sm:$0xff]   ;;  %v1439_v25 = vld [vmem:[%s1919_s0 + $0xc8] sm:$0xff]  }
  0x23   :  { %v1426_v26 = vld [vmem:[%s1919_s0 + $0x60] sm:$0xff]   ;;  %v1440_v27 = vld [vmem:[%s1919_s0 + $0xd0] sm:$0xff]   ;;  %v1427_v28 = vld [vmem:[%s1919_s0 + $0x68] sm:$0xff]  }
  0x24   :  { %v1441_v29 = vld [vmem:[%s1919_s0 + $0xd8] sm:$0xff]   ;;  %v1428_v30 = vld [vmem:[%s1919_s0 + $0x70] sm:$0xff]   ;;  %v1442_v31 = vld [vmem:[%s1919_s0 + $0xe0] sm:$0xff]  }
  0x25   :  { %v1429_v32 = vld [vmem:[%s1919_s0 + $0x78] sm:$0xff]   ;;  %v1443_v33 = vld [vmem:[%s1919_s0 + $0xe8] sm:$0xff]   ;;  %v1444_v34 = vld [vmem:[%s1919_s0 + $0xf0] sm:$0xff]  }
  0x26   :  { %1346 = vmatmul.mubr.msk.bf16.gmra.mrb[12].mxu0 %vm393_vm0, %v1421_v16  ;;  %v1445_v35 = vld [vmem:[%s1919_s0 + $0xf8] sm:$0xff]   ;;  %s1516_s0 = smov [#allocation2]  }
  0x27   :  { %1349 = vmatprep.mubr.msk.bf16.mxu0 %vm393_vm0, %v1422_v18  ;;  %s1187_s30 = sshll.u32 %s1516_s0, 4  ;;  %s1188_s30 = int_to_ptr.vmem [resolvable:$true] %s1187_s30 }
  0x28   :  { %1378 = vmatmul.mubr.msk.bf16.gmra.mrb[12].mxu1 %vm393_vm0, %v1437_v21  ;;  %s1446_s5 = scalar_lea.vmem %s1188_s30, 8192  ;;  %p1451_p1 = scmp.lt.s32.totalorder %s1188_s30, %s1188_s30 }
  0x29   :  { %1381 = vmatprep.mubr.msk.bf16.mxu1 %vm393_vm0, %v1438_v23  ;;  %p1447_p0 = scmp.ne.s32.totalorder %s1188_s30, %s1446_s5  ;;  %p1452_p2 = scmp.lt.s32.totalorder %s1446_s5, %s1446_s5 }
  0x2b   :  { %p1453_p3 = por %p1452_p2, %p1451_p1 }
  0x2d   :  { %p1454_p4 = pnand %p1453_p3, %p1447_p0 }
  0x2e   :  { %1350 = vmatmul.mubr.msk.bf16.gmra.mrb[16].mxu0 %vm393_vm0, %v1423_v20 }
  0x2f   :  { %1353 = vmatprep.mubr.msk.bf16.mxu0 %vm393_vm0, %v1424_v22 }
  0x30   :  { %1382 = vmatmul.mubr.msk.bf16.gmra.mrb[16].mxu1 %vm393_vm0, %v1439_v25 }
  0x31   :  { %1385 = vmatprep.mubr.msk.bf16.mxu1 %vm393_vm0, %v1440_v27 }
  0x36   :  { %1354 = vmatmul.mubr.msk.bf16.gmra.mrb[20].mxu0 %vm393_vm0, %v1425_v24 }
  0x37   :  { %1357 = vmatprep.mubr.msk.bf16.mxu0 %vm393_vm0, %v1426_v26 }
  0x38   :  { %1386 = vmatmul.mubr.msk.bf16.gmra.mrb[20].mxu1 %vm393_vm0, %v1441_v29 }
  0x39   :  { %1389 = vmatprep.mubr.msk.bf16.mxu1 %vm393_vm0, %v1442_v31 }
  0x3e   :  { %1358 = vmatmul.mubr.msk.bf16.gmra.mrb[24].mxu0 %vm393_vm0, %v1427_v28 }
  0x3f   :  { %1361 = vmatprep.mubr.msk.bf16.mxu0 %vm393_vm0, %v1428_v30 }
  0x40   :  { %1390 = vmatmul.mubr.msk.bf16.gmra.mrb[24].mxu1 %vm393_vm0, %v1443_v33 }
  0x41   :  { %1393 = vmatprep.mubr.msk.bf16.mxu1 %vm393_vm0, %v1444_v34 }
  0x46   :  { %1362 = vmatmul.mubr.msk.bf16.gmra.mrb[28].mxu0 %vm393_vm0, %v1429_v32 }
  0x48   :  { %1394 = vmatmul.mubr.msk.bf16.gmra.mrb[28].mxu1 %vm393_vm0, %v1445_v35 }
  0xe1   :  { %v1335_v36 = vpop.f32.mrb[0].mxu0  ;;  %v1683_v47 = vpop.f32.mrb[0].mxu1 }
  0xe2   :  { %v528_v37 = vpop.f32.mrb[1].mxu0  ;;  %849 = vst [vmem:[#allocation2 + $0x10] sm:$0xff] %v1335_v36  ;;  %v1050_v43 = vmul.f32 %v1335_v36, %v1335_v36  ;;  %v1685_v50 = vpop.f32.mrb[1].mxu1  ;;  %881 = vst [vmem:[#allocation2 + $0x110] sm:$0xff] %v1683_v47 }
  0xe3   :  { %v1336_v38 = vpop.f32.mrb[2].mxu0  ;;  %847 = vst [vmem:[#allocation2] sm:$0xff] %v528_v37  ;;  %v1048_v40 = vmul.f32 %v528_v37, %v528_v37  ;;  %v1687_v54 = vpop.f32.mrb[2].mxu1  ;;  %879 = vst [vmem:[#allocation2 + $0x100] sm:$0xff] %v1685_v50 }
  0xe4   :  { %v531_v39 = vpop.f32.mrb[3].mxu0  ;;  %850 = vst [vmem:[#allocation2 + $0x18] sm:$0xff] %v1336_v38  ;;  %v1051_v48 = vmul.f32 %v1336_v38, %v1336_v38  ;;  %v1690_v56 = vpop.f32.mrb[3].mxu1  ;;  %882 = vst [vmem:[#allocation2 + $0x118] sm:$0xff] %v1687_v54 }
  0xe5   :  { %848 = vst [vmem:[#allocation2 + $0x8] sm:$0xff] %v531_v39  ;;  %v978_v41 = vadd.f32 %v531_v39, %v528_v37  ;;  %v1049_v42 = vmul.f32 %v531_v39, %v531_v39  ;;  %880 = vst [vmem:[#allocation2 + $0x108] sm:$0xff] %v1690_v56 }
  0xe7   :  { %v979_v44 = vadd.f32 %v1335_v36, %v978_v41  ;;  %v1112_v45 = vadd.f32 %v1049_v42, %v1048_v40 }
  0xe9   :  { %v1339_v46 = vpop.f32.mrb[4].mxu0  ;;  %v1113_v51 = vadd.f32 %v1112_v45, %v1050_v43  ;;  %v980_v52 = vadd.f32 %v1336_v38, %v979_v44  ;;  %v1695_v3 = vpop.f32.mrb[4].mxu1 }
  0xea   :  { %v544_v49 = vpop.f32.mrb[5].mxu0  ;;  %853 = vst [vmem:[#allocation2 + $0x30] sm:$0xff] %v1339_v46  ;;  %v1054_v63 = vmul.f32 %v1339_v46, %v1339_v46  ;;  %v1697_v6 = vpop.f32.mrb[5].mxu1  ;;  %885 = vst [vmem:[#allocation2 + $0x130] sm:$0xff] %v1695_v3 }
  0xeb   :  { %v1340_v53 = vpop.f32.mrb[6].mxu0  ;;  %851 = vst [vmem:[#allocation2 + $0x20] sm:$0xff] %v544_v49  ;;  %v981_v57 = vadd.f32 %v980_v52, %v544_v49  ;;  %v1052_v58 = vmul.f32 %v544_v49, %v544_v49  ;;  %v1114_v59 = vadd.f32 %v1113_v51, %v1051_v48  ;;  %v1699_v10 = vpop.f32.mrb[6].mxu1  ;;  %883 = vst [vmem:[#allocation2 + $0x120] sm:$0xff] %v1697_v6 }
  0xec   :  { %v547_v55 = vpop.f32.mrb[7].mxu0  ;;  %854 = vst [vmem:[#allocation2 + $0x38] sm:$0xff] %v1340_v53  ;;  %v1055_v4 = vmul.f32 %v1340_v53, %v1340_v53  ;;  %v1702_v12 = vpop.f32.mrb[7].mxu1  ;;  %886 = vst [vmem:[#allocation2 + $0x138] sm:$0xff] %v1699_v10 }
  0xed   :  { %v1115_v60 = vadd.f32 %v1114_v59, %v1052_v58  ;;  %852 = vst [vmem:[#allocation2 + $0x28] sm:$0xff] %v547_v55  ;;  %v982_v61 = vadd.f32 %v981_v57, %v547_v55  ;;  %v1053_v62 = vmul.f32 %v547_v55, %v547_v55  ;;  %884 = vst [vmem:[#allocation2 + $0x128] sm:$0xff] %v1702_v12 }
  0xef   :  { %v983_v0 = vadd.f32 %v1339_v46, %v982_v61  ;;  %v1116_v1 = vadd.f32 %v1115_v60, %v1053_v62 }
  0xf1   :  { %v1343_v2 = vpop.f32.mrb[8].mxu0  ;;  %v1117_v7 = vadd.f32 %v1116_v1, %v1054_v63  ;;  %v984_v8 = vadd.f32 %v1340_v53, %v983_v0 }
  0xf2   :  { %v560_v5 = vpop.f32.mrb[9].mxu0  ;;  %857 = vst [vmem:[#allocation2 + $0x50] sm:$0xff] %v1343_v2  ;;  %v1058_v19 = vmul.f32 %v1343_v2, %v1343_v2 }
  0xf3   :  { %v1344_v9 = vpop.f32.mrb[10].mxu0  ;;  %855 = vst [vmem:[#allocation2 + $0x40] sm:$0xff] %v560_v5  ;;  %v985_v13 = vadd.f32 %v984_v8, %v560_v5  ;;  %v1056_v14 = vmul.f32 %v560_v5, %v560_v5  ;;  %v1118_v15 = vadd.f32 %v1117_v7, %v1055_v4  ;;  %v1707_v23 = vpop.f32.mrb[8].mxu1 }
  0xf4   :  { %v563_v11 = vpop.f32.mrb[11].mxu0  ;;  %858 = vst [vmem:[#allocation2 + $0x58] sm:$0xff] %v1344_v9  ;;  %v1059_v24 = vmul.f32 %v1344_v9, %v1344_v9  ;;  %v1709_v26 = vpop.f32.mrb[9].mxu1  ;;  %889 = vst [vmem:[#allocation2 + $0x150] sm:$0xff] %v1707_v23 }
  0xf5   :  { %v1119_v16 = vadd.f32 %v1118_v15, %v1056_v14  ;;  %856 = vst [vmem:[#allocation2 + $0x48] sm:$0xff] %v563_v11  ;;  %v986_v17 = vadd.f32 %v985_v13, %v563_v11  ;;  %v1057_v18 = vmul.f32 %v563_v11, %v563_v11  ;;  %v1711_v30 = vpop.f32.mrb[10].mxu1  ;;  %887 = vst [vmem:[#allocation2 + $0x140] sm:$0xff] %v1709_v26 }
  0xf6   :  { %v1714_v32 = vpop.f32.mrb[11].mxu1  ;;  %890 = vst [vmem:[#allocation2 + $0x158] sm:$0xff] %v1711_v30 }
  0xf7   :  { %v987_v20 = vadd.f32 %v1343_v2, %v986_v17  ;;  %v1120_v21 = vadd.f32 %v1119_v16, %v1057_v18  ;;  %888 = vst [vmem:[#allocation2 + $0x148] sm:$0xff] %v1714_v32 }
  0xf9   :  { %v1347_v22 = vpop.f32.mrb[12].mxu0  ;;  %v1121_v27 = vadd.f32 %v1120_v21, %v1058_v19  ;;  %v988_v28 = vadd.f32 %v1344_v9, %v987_v20 }
  0xfa   :  { %v576_v25 = vpop.f32.mrb[13].mxu0  ;;  %861 = vst [vmem:[#allocation2 + $0x70] sm:$0xff] %v1347_v22  ;;  %v1062_v39 = vmul.f32 %v1347_v22, %v1347_v22 }
  0xfb   :  { %v1348_v29 = vpop.f32.mrb[14].mxu0  ;;  %859 = vst [vmem:[#allocation2 + $0x60] sm:$0xff] %v576_v25  ;;  %v989_v33 = vadd.f32 %v988_v28, %v576_v25  ;;  %v1060_v34 = vmul.f32 %v576_v25, %v576_v25  ;;  %v1122_v35 = vadd.f32 %v1121_v27, %v1059_v24  ;;  %v1719_v43 = vpop.f32.mrb[12].mxu1 }
  0xfc   :  { %v579_v31 = vpop.f32.mrb[15].mxu0  ;;  %862 = vst [vmem:[#allocation2 + $0x78] sm:$0xff] %v1348_v29  ;;  %v1063_v44 = vmul.f32 %v1348_v29, %v1348_v29  ;;  %v1721_v46 = vpop.f32.mrb[13].mxu1  ;;  %893 = vst [vmem:[#allocation2 + $0x170] sm:$0xff] %v1719_v43 }
  0xfd   :  { %v1123_v36 = vadd.f32 %v1122_v35, %v1060_v34  ;;  %860 = vst [vmem:[#allocation2 + $0x68] sm:$0xff] %v579_v31  ;;  %v990_v37 = vadd.f32 %v989_v33, %v579_v31  ;;  %v1061_v38 = vmul.f32 %v579_v31, %v579_v31  ;;  %v1723_v52 = vpop.f32.mrb[14].mxu1  ;;  %891 = vst [vmem:[#allocation2 + $0x160] sm:$0xff] %v1721_v46 }
  0xfe   :  { %v1726_v55 = vpop.f32.mrb[15].mxu1  ;;  %894 = vst [vmem:[#allocation2 + $0x178] sm:$0xff] %v1723_v52 }
  0xff   :  { %v991_v40 = vadd.f32 %v1347_v22, %v990_v37  ;;  %v1124_v41 = vadd.f32 %v1123_v36, %v1061_v38  ;;  %892 = vst [vmem:[#allocation2 + $0x168] sm:$0xff] %v1726_v55 }
 0x101   :  { %v1351_v42 = vpop.f32.mrb[16].mxu0  ;;  %v1125_v48 = vadd.f32 %v1124_v41, %v1062_v39  ;;  %v992_v49 = vadd.f32 %v1348_v29, %v991_v40 }
 0x102   :  { %v592_v45 = vpop.f32.mrb[17].mxu0  ;;  %865 = vst [vmem:[#allocation2 + $0x90] sm:$0xff] %v1351_v42  ;;  %v1066_v63 = vmul.f32 %v1351_v42, %v1351_v42 }
 0x103   :  { %v1352_v51 = vpop.f32.mrb[18].mxu0  ;;  %863 = vst [vmem:[#allocation2 + $0x80] sm:$0xff] %v592_v45  ;;  %v993_v57 = vadd.f32 %v992_v49, %v592_v45  ;;  %v1064_v58 = vmul.f32 %v592_v45, %v592_v45  ;;  %v1126_v59 = vadd.f32 %v1125_v48, %v1063_v44  ;;  %v1731_v4 = vpop.f32.mrb[16].mxu1 }
 0x104   :  { %v595_v53 = vpop.f32.mrb[19].mxu0  ;;  %866 = vst [vmem:[#allocation2 + $0x98] sm:$0xff] %v1352_v51  ;;  %v1067_v5 = vmul.f32 %v1352_v51, %v1352_v51  ;;  %v1733_v8 = vpop.f32.mrb[17].mxu1  ;;  %897 = vst [vmem:[#allocation2 + $0x190] sm:$0xff] %v1731_v4 }
 0x105   :  { %v1127_v60 = vadd.f32 %v1126_v59, %v1064_v58  ;;  %864 = vst [vmem:[#allocation2 + $0x88] sm:$0xff] %v595_v53  ;;  %v994_v61 = vadd.f32 %v993_v57, %v595_v53  ;;  %v1065_v62 = vmul.f32 %v595_v53, %v595_v53  ;;  %v1735_v14 = vpop.f32.mrb[18].mxu1  ;;  %895 = vst [vmem:[#allocation2 + $0x180] sm:$0xff] %v1733_v8 }
 0x106   :  { %v1738_v16 = vpop.f32.mrb[19].mxu1  ;;  %898 = vst [vmem:[#allocation2 + $0x198] sm:$0xff] %v1735_v14 }
 0x107   :  { %v995_v0 = vadd.f32 %v1351_v42, %v994_v61  ;;  %v1128_v1 = vadd.f32 %v1127_v60, %v1065_v62  ;;  %896 = vst [vmem:[#allocation2 + $0x188] sm:$0xff] %v1738_v16 }
 0x109   :  { %v1355_v2 = vpop.f32.mrb[20].mxu0  ;;  %v1129_v9 = vadd.f32 %v1128_v1, %v1066_v63  ;;  %v996_v11 = vadd.f32 %v1352_v51, %v995_v0 }
 0x10a   :  { %v608_v7 = vpop.f32.mrb[21].mxu0  ;;  %869 = vst [vmem:[#allocation2 + $0xb0] sm:$0xff] %v1355_v2  ;;  %v1070_v24 = vmul.f32 %v1355_v2, %v1355_v2 }
 0x10b   :  { %v1356_v13 = vpop.f32.mrb[22].mxu0  ;;  %867 = vst [vmem:[#allocation2 + $0xa0] sm:$0xff] %v608_v7  ;;  %v997_v17 = vadd.f32 %v996_v11, %v608_v7  ;;  %v1068_v18 = vmul.f32 %v608_v7, %v608_v7  ;;  %v1130_v19 = vadd.f32 %v1129_v9, %v1067_v5  ;;  %v1743_v29 = vpop.f32.mrb[20].mxu1 }
 0x10c   :  { %v611_v15 = vpop.f32.mrb[23].mxu0  ;;  %870 = vst [vmem:[#allocation2 + $0xb8] sm:$0xff] %v1356_v13  ;;  %v1071_v31 = vmul.f32 %v1356_v13, %v1356_v13  ;;  %v1745_v34 = vpop.f32.mrb[21].mxu1  ;;  %901 = vst [vmem:[#allocation2 + $0x1b0] sm:$0xff] %v1743_v29 }
 0x10d   :  { %v1131_v20 = vadd.f32 %v1130_v19, %v1068_v18  ;;  %868 = vst [vmem:[#allocation2 + $0xa8] sm:$0xff] %v611_v15  ;;  %v998_v21 = vadd.f32 %v997_v17, %v611_v15  ;;  %v1069_v22 = vmul.f32 %v611_v15, %v611_v15  ;;  %v1747_v38 = vpop.f32.mrb[22].mxu1  ;;  %899 = vst [vmem:[#allocation2 + $0x1a0] sm:$0xff] %v1745_v34 }
 0x10e   :  { %v1750_v40 = vpop.f32.mrb[23].mxu1  ;;  %902 = vst [vmem:[#allocation2 + $0x1b8] sm:$0xff] %v1747_v38 }
 0x10f   :  { %v999_v25 = vadd.f32 %v1355_v2, %v998_v21  ;;  %v1132_v27 = vadd.f32 %v1131_v20, %v1069_v22  ;;  %900 = vst [vmem:[#allocation2 + $0x1a8] sm:$0xff] %v1750_v40 }
 0x111   :  { %v1359_v28 = vpop.f32.mrb[24].mxu0  ;;  %v1133_v35 = vadd.f32 %v1132_v27, %v1070_v24  ;;  %v1000_v36 = vadd.f32 %v1356_v13, %v999_v25  ;;  %v1080_v24 = vmul.f32 %v1685_v50, %v1685_v50 }
 0x112   :  { %v624_v33 = vpop.f32.mrb[25].mxu0  ;;  %873 = vst [vmem:[#allocation2 + $0xd0] sm:$0xff] %v1359_v28  ;;  %v1074_v51 = vmul.f32 %v1359_v28, %v1359_v28 }
 0x113   :  { %v1360_v37 = vpop.f32.mrb[26].mxu0  ;;  %871 = vst [vmem:[#allocation2 + $0xc0] sm:$0xff] %v624_v33  ;;  %v1001_v41 = vadd.f32 %v1000_v36, %v624_v33  ;;  %v1072_v42 = vmul.f32 %v624_v33, %v624_v33  ;;  %v1134_v44 = vadd.f32 %v1133_v35, %v1071_v31  ;;  %v1755_v59 = vpop.f32.mrb[24].mxu1 }
 0x114   :  { %v627_v39 = vpop.f32.mrb[27].mxu0  ;;  %874 = vst [vmem:[#allocation2 + $0xd8] sm:$0xff] %v1360_v37  ;;  %v1075_v60 = vmul.f32 %v1360_v37, %v1360_v37  ;;  %v1757_v62 = vpop.f32.mrb[25].mxu1  ;;  %905 = vst [vmem:[#allocation2 + $0x1d0] sm:$0xff] %v1755_v59 }
 0x115   :  { %v1135_v45 = vadd.f32 %v1134_v44, %v1072_v42  ;;  %872 = vst [vmem:[#allocation2 + $0xc8] sm:$0xff] %v627_v39  ;;  %v1002_v48 = vadd.f32 %v1001_v41, %v627_v39  ;;  %v1073_v49 = vmul.f32 %v627_v39, %v627_v39  ;;  %v1759_v2 = vpop.f32.mrb[26].mxu1  ;;  %903 = vst [vmem:[#allocation2 + $0x1c0] sm:$0xff] %v1757_v62 }
 0x116   :  { %v1762_v7 = vpop.f32.mrb[27].mxu1  ;;  %906 = vst [vmem:[#allocation2 + $0x1d8] sm:$0xff] %v1759_v2  ;;  %v1081_v42 = vmul.f32 %v1690_v56, %v1690_v56 }
 0x117   :  { %v1003_v53 = vadd.f32 %v1359_v28, %v1002_v48  ;;  %v1136_v57 = vadd.f32 %v1135_v45, %v1073_v49  ;;  %904 = vst [vmem:[#allocation2 + $0x1c8] sm:$0xff] %v1762_v7 }
 0x119   :  { %v1363_v58 = vpop.f32.mrb[28].mxu0  ;;  %v1137_v63 = vadd.f32 %v1136_v57, %v1074_v51  ;;  %v1004_v0 = vadd.f32 %v1360_v37, %v1003_v53 }
 0x11a   :  { %v640_v61 = vpop.f32.mrb[29].mxu0  ;;  %877 = vst [vmem:[#allocation2 + $0xf0] sm:$0xff] %v1363_v58  ;;  %v1078_v19 = vmul.f32 %v1363_v58, %v1363_v58 }
 0x11b   :  { %v1364_v1 = vpop.f32.mrb[30].mxu0  ;;  %875 = vst [vmem:[#allocation2 + $0xe0] sm:$0xff] %v640_v61  ;;  %v1005_v9 = vadd.f32 %v1004_v0, %v640_v61  ;;  %v1076_v11 = vmul.f32 %v640_v61, %v640_v61  ;;  %v1138_v13 = vadd.f32 %v1137_v63, %v1075_v60  ;;  %v1767_v22 = vpop.f32.mrb[28].mxu1 }
 0x11c   :  { %v643_v5 = vpop.f32.mrb[31].mxu0  ;;  %878 = vst [vmem:[#allocation2 + $0xf8] sm:$0xff] %v1364_v1  ;;  %v1771_v25 = vpop.f32.mrb[29].mxu1  ;;  %v1079_v27 = vmul.f32 %v1364_v1, %v1364_v1  ;;  %909 = vst [vmem:[#allocation2 + $0x1f0] sm:$0xff] %v1767_v22 }
 0x11d   :  { %v1139_v15 = vadd.f32 %v1138_v13, %v1076_v11  ;;  %876 = vst [vmem:[#allocation2 + $0xe8] sm:$0xff] %v643_v5  ;;  %v1006_v17 = vadd.f32 %v1005_v9, %v643_v5  ;;  %v1077_v18 = vmul.f32 %v643_v5, %v643_v5  ;;  %v1773_v33 = vpop.f32.mrb[30].mxu1  ;;  %907 = vst [vmem:[#allocation2 + $0x1e0] sm:$0xff] %v1771_v25 }
 0x11e   :  { %v1776_v35 = vpop.f32.mrb[31].mxu1  ;;  %910 = vst [vmem:[#allocation2 + $0x1f8] sm:$0xff] %v1773_v33 }
 0x11f   :  { %v1007_v20 = vadd.f32 %v1363_v58, %v1006_v17  ;;  %v1140_v21 = vadd.f32 %v1139_v15, %v1077_v18  ;;  %908 = vst [vmem:[#allocation2 + $0x1e8] sm:$0xff] %v1776_v35 }
 0x121   :  { %v1141_v28 = vadd.f32 %v1140_v21, %v1078_v19  ;;  %v1008_v31 = vadd.f32 %v1364_v1, %v1007_v20 }
 0x123   :  { %v1009_v36 = vadd.f32 %v1008_v31, %v1685_v50  ;;  %v1142_v37 = vadd.f32 %v1141_v28, %v1079_v27 }
 0x125   :  { %v1143_v39 = vadd.f32 %v1142_v37, %v1080_v24  ;;  %v1010_v41 = vadd.f32 %v1009_v36, %v1690_v56 }
 0x126   :  { %1457 = shalt.err (!%p1454_p4)
}
 0x127   :  { %s1458_s8 = scalar_lea.hbm %s1921_s2, 8192 }
 0x128   :  { %p1459_p5 = scmp.ne.s32.totalorder %s1921_s2, %s1458_s8  ;;  %p1462_p6 = scmp.lt.u32.totalorder %s1458_s8, %s1921_s2 }
 0x12a   :  { %p1464_p7 = pnand %p1462_p6, %p1459_p5 }
 0x12c   :  { %1467 = shalt.err (!%p1464_p7)
}
 0x12d   :  { %s1517_s13 = smov 128   ;;  %s1518_s14 = smov 8   ;;  %v1082_v50 = vmul.f32 %v1683_v47, %v1683_v47  ;;  %v1011_v56 = vadd.f32 %v1683_v47, %v1010_v41  ;;  %v1144_v44 = vadd.f32 %v1143_v39, %v1081_v42  ;;  %v1083_v45 = vmul.f32 %v1687_v54, %v1687_v54 }
 0x12e   :  { %1193 = dma.vmem_to_hbm [thread:$0]  %s1188_s30, 8192, %s1921_s2, [#allocation3], %s1517_s13, %s1517_s13, %s1518_s14   ;;  %v1084_v51 = vmul.f32 %v1697_v6, %v1697_v6  ;;  %v1085_v61 = vmul.f32 %v1702_v12, %v1702_v12  ;;  %v1086_v47 = vmul.f32 %v1695_v3, %v1695_v3  ;;  %v1089_v15 = vmul.f32 %v1714_v32, %v1714_v32 }
 0x12f   :  { %v1145_v48 = vadd.f32 %v1144_v44, %v1082_v50  ;;  %v1012_v49 = vadd.f32 %v1687_v54, %v1011_v56  ;;  %v1087_v54 = vmul.f32 %v1699_v10, %v1699_v10  ;;  %v1093_v28 = vmul.f32 %v1726_v55, %v1726_v55  ;;  %s1519_s2 = smov [#allocation4]   ;;  %s1520_s18 = smov [#allocation6]  }
 0x130   :  { %v1098_v44 = vmul.f32 %v1731_v4, %v1731_v4  ;;  %s1200_s17 = sshll.u32 %s1519_s2, 4  ;;  %s1210_s19 = sshll.u32 %s1520_s18, 4  ;;  %s1201_s17 = int_to_ptr.vmem [resolvable:$true] %s1200_s17  ;;  %s1887_s19 = int_to_ptr.vmem [resolvable:$true] %s1210_s19 }
 0x131   :  { %v1013_v53 = vadd.f32 %v1012_v49, %v1697_v6  ;;  %v1146_v57 = vadd.f32 %v1145_v48, %v1083_v45  ;;  %v1088_v6 = vmul.f32 %v1709_v26, %v1709_v26  ;;  %v1099_v48 = vmul.f32 %v1735_v14, %v1735_v14  ;;  %s1468_s20 = scalar_lea.vmem %s1201_s17, 16  ;;  %s1472_s21 = scalar_lea.vmem %s1201_s17, 32 }
 0x132   :  { %p1469_p8 = scmp.ne.s32.totalorder %s1201_s17, %s1468_s20  ;;  %p1473_p9 = scmp.lt.s32.totalorder %s1201_s17, %s1201_s17 }
 0x133   :  { %v1147_v58 = vadd.f32 %v1146_v57, %v1084_v51  ;;  %v1014_v60 = vadd.f32 %v1013_v53, %v1702_v12  ;;  %v1101_v57 = vmul.f32 %v1750_v40, %v1750_v40  ;;  %p1474_p10 = scmp.lt.s32.totalorder %s1472_s21, %s1468_s20 }
 0x135   :  { %v1015_v63 = vadd.f32 %v1695_v3, %v1014_v60  ;;  %v1148_v0 = vadd.f32 %v1147_v58, %v1085_v61  ;;  %v1090_v3 = vmul.f32 %v1707_v23, %v1707_v23  ;;  %v1102_v60 = vmul.f32 %v1743_v29, %v1743_v29  ;;  %p1475_p11 = por %p1474_p10, %p1473_p9 }
 0x137   :  { %v1149_v1 = vadd.f32 %v1148_v0, %v1086_v47  ;;  %v1016_v5 = vadd.f32 %v1699_v10, %v1015_v63  ;;  %v1091_v10 = vmul.f32 %v1711_v30, %v1711_v30  ;;  %v1103_v47 = vmul.f32 %v1747_v38, %v1747_v38  ;;  %p1476_p12 = pnand %p1475_p11, %p1469_p8 }
 0x139   :  { %v1017_v9 = vadd.f32 %v1016_v5, %v1709_v26  ;;  %v1150_v11 = vadd.f32 %v1149_v1, %v1087_v54  ;;  %v1092_v26 = vmul.f32 %v1721_v46, %v1721_v46  ;;  %v1105_v1 = vmul.f32 %v1762_v7, %v1762_v7 }
 0x13b   :  { %v1151_v13 = vadd.f32 %v1150_v11, %v1088_v6  ;;  %v1018_v12 = vadd.f32 %v1017_v9, %v1714_v32  ;;  %v1106_v6 = vmul.f32 %v1755_v59, %v1755_v59  ;;  %v1107_v11 = vmul.f32 %v1759_v2, %v1759_v2 }
 0x13d   :  { %v1019_v17 = vadd.f32 %v1707_v23, %v1018_v12  ;;  %v1152_v18 = vadd.f32 %v1151_v13, %v1089_v15  ;;  %v1094_v23 = vmul.f32 %v1719_v43, %v1719_v43 }
 0x13f   :  { %v1153_v19 = vadd.f32 %v1152_v18, %v1090_v3  ;;  %v1020_v20 = vadd.f32 %v1711_v30, %v1019_v17  ;;  %v1095_v30 = vmul.f32 %v1723_v52, %v1723_v52  ;;  %v1109_v3 = vmul.f32 %v1776_v35, %v1776_v35 }
 0x140   :  { %v1110_v18 = vmul.f32 %v1767_v22, %v1767_v22 }
 0x141   :  { %v1021_v21 = vadd.f32 %v1020_v20, %v1721_v46  ;;  %v1154_v24 = vadd.f32 %v1153_v19, %v1091_v10  ;;  %v1096_v46 = vmul.f32 %v1733_v8, %v1733_v8  ;;  %v1111_v19 = vmul.f32 %v1773_v33, %v1773_v33 }
 0x143   :  { %v1155_v27 = vadd.f32 %v1154_v24, %v1092_v26  ;;  %v1022_v32 = vadd.f32 %v1021_v21, %v1726_v55  ;;  %v1097_v55 = vmul.f32 %v1738_v16, %v1738_v16 }
 0x145   :  { %v1023_v31 = vadd.f32 %v1719_v43, %v1022_v32  ;;  %v1156_v36 = vadd.f32 %v1155_v27, %v1093_v28 }
 0x147   :  { %v1157_v37 = vadd.f32 %v1156_v36, %v1094_v23  ;;  %v1024_v39 = vadd.f32 %v1723_v52, %v1023_v31 }
 0x149   :  { %v1025_v41 = vadd.f32 %v1024_v39, %v1733_v8  ;;  %v1158_v42 = vadd.f32 %v1157_v37, %v1095_v30  ;;  %v1100_v8 = vmul.f32 %v1745_v34, %v1745_v34 }
 0x14b   :  { %v1026_v50 = vadd.f32 %v1025_v41, %v1738_v16  ;;  %v1159_v56 = vadd.f32 %v1158_v42, %v1096_v46 }
 0x14d   :  { %v1027_v43 = vadd.f32 %v1731_v4, %v1026_v50  ;;  %v1160_v45 = vadd.f32 %v1159_v56, %v1097_v55 }
 0x14f   :  { %v1028_v52 = vadd.f32 %v1735_v14, %v1027_v43  ;;  %v1161_v49 = vadd.f32 %v1160_v45, %v1098_v44 }
 0x151   :  { %v1029_v51 = vadd.f32 %v1028_v52, %v1745_v34  ;;  %v1162_v53 = vadd.f32 %v1161_v49, %v1099_v48  ;;  %v1104_v34 = vmul.f32 %v1757_v62, %v1757_v62 }
 0x153   :  { %v1030_v16 = vadd.f32 %v1029_v51, %v1750_v40  ;;  %v1163_v58 = vadd.f32 %v1162_v53, %v1100_v8 }
 0x155   :  { %v1031_v4 = vadd.f32 %v1743_v29, %v1030_v16  ;;  %v1164_v61 = vadd.f32 %v1163_v58, %v1101_v57 }
 0x157   :  { %v1032_v14 = vadd.f32 %v1747_v38, %v1031_v4  ;;  %v1165_v63 = vadd.f32 %v1164_v61, %v1102_v60 }
 0x159   :  { %v1033_v0 = vadd.f32 %v1032_v14, %v1757_v62  ;;  %v1166_v54 = vadd.f32 %v1165_v63, %v1103_v47  ;;  %v1108_v62 = vmul.f32 %v1771_v25, %v1771_v25 }
 0x15b   :  { %v1034_v40 = vadd.f32 %v1033_v0, %v1762_v7  ;;  %v1167_v5 = vadd.f32 %v1166_v54, %v1104_v34 }
 0x15d   :  { %v1035_v29 = vadd.f32 %v1755_v59, %v1034_v40  ;;  %v1168_v9 = vadd.f32 %v1167_v5, %v1105_v1 }
 0x15f   :  { %v1036_v38 = vadd.f32 %v1759_v2, %v1035_v29  ;;  %v1169_v13 = vadd.f32 %v1168_v9, %v1106_v6 }
 0x161   :  { %v1037_v12 = vadd.f32 %v1036_v38, %v1771_v25  ;;  %v1170_v15 = vadd.f32 %v1169_v13, %v1107_v11 }
 0x163   :  { %v1038_v7 = vadd.f32 %v1037_v12, %v1776_v35  ;;  %v1171_v17 = vadd.f32 %v1170_v15, %v1108_v62 }
 0x165   :  { %v1039_v59 = vadd.f32 %v1767_v22, %v1038_v7  ;;  %v1172_v10 = vadd.f32 %v1171_v17, %v1109_v3 }
 0x167   :  { %v1040_v2 = vadd.f32 %v1773_v33, %v1039_v59  ;;  %v1173_v20 = vadd.f32 %v1172_v10, %v1110_v18 }
 0x169   :  { %v1041_v25 = vrot.slane %v1040_v2, 4  ;;  %v1174_v26 = vadd.f32 %v1173_v20, %v1111_v19 }
 0x16b   :  { %v1042_v21 = vadd.f32 %v1041_v25, %v1040_v2  ;;  %v1175_v24 = vrot.slane %v1174_v26, 4 }
 0x16d   :  { %v1043_v27 = vrot.slane %v1042_v21, 2  ;;  %v1176_v32 = vadd.f32 %v1175_v24, %v1174_v26 }
 0x16f   :  { %v1044_v35 = vadd.f32 %v1043_v27, %v1042_v21  ;;  %v1177_v28 = vrot.slane %v1176_v32, 2 }
 0x171   :  { %v1045_v23 = vrot.slane %v1044_v35, 1  ;;  %v1178_v31 = vadd.f32 %v1177_v28, %v1176_v32 }
 0x173   :  { %v1046_v22 = vadd.f32 %v1045_v23, %v1044_v35  ;;  %v1179_v36 = vrot.slane %v1178_v31, 1 }
 0x175   :  { %1047 = vst [vmem:[#allocation4] sm:$0x1] %v1046_v22  ;;  %v1180_v33 = vadd.f32 %v1179_v36, %v1178_v31 }
 0x176   :  { %1479 = shalt.err (!%p1476_p12)
}
 0x177   :  { %s1480_s24 = scalar_lea.hbm %s1922_s3, 16 }
 0x178   :  { %p1481_p13 = scmp.ne.s32.totalorder %s1922_s3, %s1480_s24  ;;  %p1484_p0 = scmp.lt.u32.totalorder %s1480_s24, %s1922_s3 }
 0x17a   :  { %p1486_p1 = pnand %p1484_p0, %p1481_p13 }
 0x17c   :  { %1489 = shalt.err (!%p1486_p1)
}
 0x17d   :  { %1203 = dma.vmem_to_hbm [thread:$0]  %s1201_s17, 16, %s1922_s3, [#allocation5]   ;;  %1181 = vst [vmem:[#allocation6] sm:$0x1] %v1180_v33 }
 0x17e   :  { %s1490_s0 = scalar_lea.vmem %s1887_s19, 16  ;;  %s1494_s30 = scalar_lea.vmem %s1887_s19, 32 }
 0x17f   :  { %p1491_p2 = scmp.ne.s32.totalorder %s1887_s19, %s1490_s0  ;;  %p1495_p3 = scmp.lt.s32.totalorder %s1887_s19, %s1887_s19 }
 0x180   :  { %p1496_p4 = scmp.lt.s32.totalorder %s1494_s30, %s1490_s0 }
 0x182   :  { %p1497_p5 = por %p1496_p4, %p1495_p3 }
 0x184   :  { %p1498_p6 = pnand %p1497_p5, %p1491_p2 }
 0x186   :  { %1501 = shalt.err (!%p1498_p6)
}
 0x187   :  { %s1502_s7 = scalar_lea.hbm %s1923_s4, 16 }
 0x188   :  { %p1503_p7 = scmp.ne.s32.totalorder %s1923_s4, %s1502_s7  ;;  %p1506_p8 = scmp.lt.u32.totalorder %s1502_s7, %s1923_s4 }
 0x18a   :  { %p1508_p9 = pnand %p1506_p8, %p1503_p7 }
 0x18c   :  { %1511 = shalt.err (!%p1508_p9)
}
 0x18d   :  { %1213 = dma.vmem_to_hbm [thread:$0]  %s1887_s19, 16, %s1923_s4, [#allocation5]  }
 0x18e   :  { %1512 = dma.done.wait [#allocation3], 8192  }
 0x18f   :  { %1513 = vsyncadd [#allocation3], 4294959104 }
 0x190   :  { %1514 = dma.done.wait [#allocation5], 32  }
 0x191   :  { %1515 = vsyncadd [#allocation5], 4294967264 }
 0x192   :  { %1223 = vsyncpa [#allocation3], 1 }
 0x193   :  { %1224 = vsyncpa [#allocation5], 1 }

</bundles_post_ra>
